<compile_context>
chip_gen: v5e
topology: v5e:2x2
jax: 0.10.0
libtpu: 0.0.40
codegen_flags: <defaults>
</compile_context>

<pallas_src>
import functools

import jax
import jax.numpy as jnp
from jax.experimental import pallas as pl
from jax.experimental.pallas import tpu as pltpu

_LANES = 128
_SUBLANES = 8


def _round_up(x, m):
    return ((x + m - 1) // m) * m


def _max_tile_rows():
    """Generation-dependent tile height (rows of 128 lanes)."""
    try:
        kind = jax.devices()[0].device_kind.lower()
    except Exception:
        return 4096
    if "v6" in kind or "v7" in kind:
        # 8192*128*4B = 4 MiB/f32 block; 2 inputs x 2 buffers = 16 MiB,
        # comfortably under the 32 MiB scoped-VMEM default on v6e/v7x.
        return 8192
    # v5e: 16 MiB scoped default -> keep 2 MiB blocks.
    return 4096


def _num_tensorcores():
    try:
        kind = jax.devices()[0].device_kind.lower()
        return 2 if "v7" in kind else 1
    except Exception:
        return 1


def _l1_loss_kernel(pred_ref, gts_ref, *out_refs, min_depth, max_depth,
                    normalize, approx_reciprocal, rows, tile_rows,
                    tiles_per_chunk, need_row_mask):
    # grid = (B, P, tiles_per_chunk, C)
    p = pl.program_id(1)
    t = pl.program_id(2)
    c = pl.program_id(3)

    sum_ref = out_refs[0]
    cnt_ref = out_refs[1] if normalize else None

    @pl.when(jnp.logical_and(t == 0, c == 0))
    def _():
        sum_ref[...] = jnp.zeros_like(sum_ref)
        if normalize:
            cnt_ref[...] = jnp.zeros_like(cnt_ref)

    # Native-dtype DMA; widen to f32 in-kernel and accumulate in f32.
    pred = pred_ref[...].astype(jnp.float32)   # (tile_rows, 128)
    gts = gts_ref[...].astype(jnp.float32)     # (tile_rows, 128)

    mask = jnp.logical_and(gts > min_depth, gts < max_depth)

    if need_row_mask:
        # Ragged last tile: block may extend past `rows`; out-of-bounds block
        # contents are unspecified, so gate them by global row index.
        global_tile = p * tiles_per_chunk + t
        row0 = global_tile * tile_rows
        row_idx = row0 + jax.lax.broadcasted_iota(
            jnp.int32, (tile_rows, _LANES), 0)
        mask = jnp.logical_and(mask, row_idx < rows)

    diff = jnp.abs(pred - gts)

    if normalize:
        if approx_reciprocal:
            # EUP slot -> effectively free next to the VPU work.
            val = jnp.where(mask, diff * pl.reciprocal(gts, approx=True), 0.0)
        else:
            val = jnp.where(mask, diff / gts, 0.0)
    else:
        # Only the masked-diff sum is needed for this path; the per-batch
        # pixel count cancels algebraically (single divide in the wrapper).
        val = jnp.where(mask, diff, 0.0)

    # (tile_rows, 128) -> (tile_rows//8, 8, 128); axis-0 sum is pure VALU
    # vreg adds into a single-vreg accumulator (no per-tile XLU collapse).
    groups = tile_rows // _SUBLANES
    sum_ref[...] += jnp.sum(val.reshape(groups, _SUBLANES, _LANES), axis=0)
    if normalize:
        cnt_ref[...] += jnp.sum(
            mask.astype(jnp.float32).reshape(groups, _SUBLANES, _LANES),
            axis=0)


def l1_loss(depth_prediction, gts, max_depth=10.0, min_depth=0.001,
            normalize=False, approx_reciprocal=True):
    """Pallas equivalent of L1Loss.forward(depth_prediction, gts)."""
    B, H, W = depth_prediction.shape
    Bg, C, Hg, Wg = gts.shape
    assert (B, H, W) == (Bg, Hg, Wg), "pred/gts spatial shapes must match"

    N = H * W
    rows = pl.cdiv(N, _LANES)
    n128 = rows * _LANES

    pred_flat = depth_prediction.reshape(B, N)
    gts_flat = gts.reshape(B, C, N)
    if n128 != N:
        # Minimal pad to a 128 multiple (needed only for the lane reshape).
        # gts pad value == min_depth fails the strict `gts > min_depth`
        # check, so padded elements are masked out for any min_depth.
        pred_flat = jnp.pad(pred_flat, ((0, 0), (0, n128 - N)))
        gts_flat = jnp.pad(gts_flat, ((0, 0), (0, 0), (0, n128 - N)),
                           constant_values=float(min_depth))

    pred3 = pred_flat.reshape(B, rows, _LANES)        # (B, rows, 128)
    gts4 = gts_flat.reshape(B, C, rows, _LANES)       # (B, C, rows, 128)

    # --- Tiling: balanced tiles, generation-dependent max size -------------
    max_tile_rows = _max_tile_rows()
    natural_tiles = pl.cdiv(rows, max_tile_rows)
    # v7x has 2 TCs: guarantee a 'parallel' axis of extent >= 2 when B == 1
    # by splitting the tile axis into 2 chunks with separate partial sums.
    P = 2 if (_num_tensorcores() >= 2 and B == 1 and natural_tiles >= 2) else 1
    tiles_per_chunk = max(1, pl.cdiv(natural_tiles, P))
    total_tiles = P * tiles_per_chunk
    tile_rows = _round_up(pl.cdiv(rows, total_tiles), _SUBLANES)
    need_row_mask = (total_tiles * tile_rows != rows)

    kernel = functools.partial(
        _l1_loss_kernel,
        min_depth=float(min_depth), max_depth=float(max_depth),
        normalize=normalize, approx_reciprocal=approx_reciprocal,
        rows=rows, tile_rows=tile_rows, tiles_per_chunk=tiles_per_chunk,
        need_row_mask=need_row_mask)

    # pred's index_map ignores c -> block stays resident across channels.
    pred_spec = pl.BlockSpec(
        (None, tile_rows, _LANES),
        lambda b, p, t, c: (b, p * tiles_per_chunk + t, 0))
    gts_spec = pl.BlockSpec(
        (None, None, tile_rows, _LANES),
        lambda b, p, t, c: (b, c, p * tiles_per_chunk + t, 0))
    out_spec = pl.BlockSpec(
        (None, None, _SUBLANES, _LANES),
        lambda b, p, t, c: (b, p, 0, 0))
    out_struct = jax.ShapeDtypeStruct((B, P, _SUBLANES, _LANES), jnp.float32)

    if normalize:
        out_shape = (out_struct, out_struct)
        out_specs = (out_spec, out_spec)
    else:
        out_shape = out_struct
        out_specs = out_spec

    n_elems = B * C * rows * _LANES
    bytes_in = (B * rows * _LANES * pred3.dtype.itemsize
                + n_elems * gts4.dtype.itemsize)
    cost = pl.CostEstimate(
        flops=8 * n_elems,
        transcendentals=n_elems if normalize else 0,
        bytes_accessed=bytes_in
        + (2 if normalize else 1) * B * P * _SUBLANES * _LANES * 4)

    result = pl.pallas_call(
        kernel,
        out_shape=out_shape,
        grid=(B, P, tiles_per_chunk, C),
        in_specs=[pred_spec, gts_spec],
        out_specs=out_specs,
        compiler_params=pltpu.CompilerParams(
            dimension_semantics=("parallel", "parallel",
                                 "arbitrary", "arbitrary")),
        cost_estimate=cost,
    )(pred3, gts4)

    if normalize:
        sum_out, cnt_out = result
        s_b = jnp.sum(sum_out, axis=(1, 2, 3))   # per-batch sum(diff/gts)
        c_b = jnp.sum(cnt_out, axis=(1, 2, 3))   # per-batch mask count
        return jnp.mean(s_b / c_b)
    else:
        total_pixels = jnp.float32(C * H * W)
        # loss1 * weight telescopes exactly:
        #   (S/(n+eps)) * ((n+eps)/total) == S/total   (eps cancels).
        return jnp.sum(result) / total_pixels


# --------------------------- plain-JAX references ---------------------------

def _l1_loss_ref(pred, gts, max_depth=10.0, min_depth=0.001):
    # normalize=False path, faithful to the PyTorch module.
    pred = pred[:, None, :, :]
    mask = jnp.logical_and(gts > min_depth, gts < max_depth)
    diff = jnp.where(mask, jnp.abs(pred - gts), 0.0)
    diff = diff.reshape(diff.shape[0], -1)
    num_pixels = mask.reshape(mask.shape[0], -1).sum(-1).astype(
        jnp.float32) + 1e-6
    loss1 = diff.sum(-1) / num_pixels
    total_pixels = gts.shape[1] * gts.shape[2] * gts.shape[3]
    weight = num_pixels / total_pixels
    return (loss1 * weight).sum()


def _l1_loss_ref_norm(pred, gts, max_depth=10.0, min_depth=0.001):
    # normalize=True path.
    pred = pred[:, None, :, :]
    mask = jnp.logical_and(gts > min_depth, gts < max_depth)
    diff = jnp.abs(pred - gts)
    loss = jnp.where(mask, diff / gts, 0.0)
    loss = loss.sum(axis=(1, 2, 3)) / mask.sum(axis=(1, 2, 3))
    return loss.mean()


if __name__ == "__main__":
    key = jax.random.PRNGKey(0)
    k1, k2, k3, k4, k5 = jax.random.split(key, 5)
    B, C, H, W = 2, 1, 16, 16

    # Deterministic inputs; gts covers values outside [min_depth, max_depth]
    # so the range mask actually does something.
    depth_prediction = jax.random.uniform(k1, (B, H, W), jnp.float32,
                                          minval=0.0, maxval=10.0)
    gts = jax.random.uniform(k2, (B, C, H, W), jnp.float32,
                             minval=0.0, maxval=12.0)

    # normalize=False (default) path — algebraic match to the module.
    loss = jax.block_until_ready(l1_loss(depth_prediction, gts))
    ref = _l1_loss_ref(depth_prediction, gts)
    assert jnp.allclose(loss, ref, rtol=1e-5, atol=1e-6), (loss, ref)

    # normalize=True path — looser tolerance because of the EUP approximate
    # reciprocal used in-kernel (pass approx_reciprocal=False for exactness).
    loss_n = jax.block_until_ready(
        l1_loss(depth_prediction, gts, normalize=True))
    ref_n = _l1_loss_ref_norm(depth_prediction, gts)
    assert jnp.allclose(loss_n, ref_n, rtol=2e-2, atol=1e-5), (loss_n, ref_n)

    # C > 1 path: pred block kept resident across C in-kernel (no HBM
    # broadcast of pred in the wrapper).
    C2 = 4
    gts_c = jax.random.uniform(k3, (B, C2, H, W), jnp.float32,
                               minval=0.0, maxval=12.0)
    loss_c = jax.block_until_ready(l1_loss(depth_prediction, gts_c))
    ref_c = _l1_loss_ref(depth_prediction, gts_c)
    assert jnp.allclose(loss_c, ref_c, rtol=1e-5, atol=1e-6), (loss_c, ref_c)

    # Non-multiple-of-128 spatial size: exercises the min_depth element pad
    # and the in-kernel ragged row mask.
    H2, W2 = 9, 14
    pred_r = jax.random.uniform(k4, (B, H2, W2), jnp.float32,
                                minval=0.0, maxval=10.0)
    gts_r = jax.random.uniform(k5, (B, 1, H2, W2), jnp.float32,
                               minval=0.0, maxval=12.0)
    loss_r = jax.block_until_ready(l1_loss(pred_r, gts_r))
    ref_r = _l1_loss_ref(pred_r, gts_r)
    assert jnp.allclose(loss_r, ref_r, rtol=1e-5, atol=1e-6), (loss_r, ref_r)

    print("KERNEL_OK")
</pallas_src>

<mosaic_0001>
module attributes {stable_mosaic.version = 11 : i64} {
  func.func @_l1_loss_kernel(%arg0: i32, %arg1: i32, %arg2: i32, %arg3: i32, %arg4: memref<1x8x128xf32, #tpu.memory_space<vmem>>, %arg5: memref<1x1x8x128xf32, #tpu.memory_space<vmem>>, %arg6: memref<1x1x8x128xf32, #tpu.memory_space<vmem>>) attributes {dimension_semantics = [#tpu.dimension_semantics<parallel>, #tpu.dimension_semantics<parallel>, #tpu.dimension_semantics<arbitrary>, #tpu.dimension_semantics<arbitrary>], iteration_bounds = array<i64: 2, 1, 1, 1>, scalar_prefetch = 0 : i64, scratch_operands = 0 : i64, tpu.core_type = #tpu.core_type<tc>, window_params = [{transform_indices = @transform_0, window_bounds = array<i64: 1, 8, 128>}, {transform_indices = @transform_1, window_bounds = array<i64: 1, 1, 8, 128>}, {transform_indices = @transform_2, window_bounds = array<i64: 1, 1, 8, 128>}]} {
    %c0_i32 = arith.constant 0 : i32
    %0 = arith.cmpi eq, %arg2, %c0_i32 : i32
    %c0_i32_0 = arith.constant 0 : i32
    %1 = arith.cmpi eq, %arg3, %c0_i32_0 : i32
    %2 = arith.andi %0, %1 : i1
    %3 = arith.extui %2 : i1 to i32
    %c0_i32_1 = arith.constant 0 : i32
    %4 = arith.cmpi ne, %3, %c0_i32_1 : i32
    scf.if %4 {
      %cst_19 = arith.constant 0.000000e+00 : f32
      %35 = vector.broadcast %cst_19 : f32 to vector<8x128xf32>
      %c0_20 = arith.constant 0 : index
      %c0_21 = arith.constant 0 : index
      %c0_22 = arith.constant 0 : index
      %c0_23 = arith.constant 0 : index
      %36 = vector.load %arg6[%c0_20, %c0_21, %c0_22, %c0_23] : memref<1x1x8x128xf32, #tpu.memory_space<vmem>>, vector<1x1x8x128xf32>
      %37 = vector.shape_cast %36 : vector<1x1x8x128xf32> to vector<8x128xf32>
      %38 = vector.shape_cast %35 : vector<8x128xf32> to vector<1x1x8x128xf32>
      tpu.vector_store %arg6[%c0_20, %c0_21, %c0_22, %c0_23], %38 {strides = array<i32>} : memref<1x1x8x128xf32, #tpu.memory_space<vmem>>, vector<1x1x8x128xf32>,
    } else {
    }
    %c0 = arith.constant 0 : index
    %c0_2 = arith.constant 0 : index
    %c0_3 = arith.constant 0 : index
    %5 = vector.load %arg4[%c0, %c0_2, %c0_3] : memref<1x8x128xf32, #tpu.memory_space<vmem>>, vector<1x8x128xf32>
    %6 = vector.shape_cast %5 : vector<1x8x128xf32> to vector<8x128xf32>
    %c0_4 = arith.constant 0 : index
    %c0_5 = arith.constant 0 : index
    %c0_6 = arith.constant 0 : index
    %c0_7 = arith.constant 0 : index
    %7 = vector.load %arg5[%c0_4, %c0_5, %c0_6, %c0_7] : memref<1x1x8x128xf32, #tpu.memory_space<vmem>>, vector<1x1x8x128xf32>
    %8 = vector.shape_cast %7 : vector<1x1x8x128xf32> to vector<8x128xf32>
    %cst = arith.constant 1.000000e-03 : f32
    %9 = vector.broadcast %cst : f32 to vector<8x128xf32>
    %10 = arith.cmpf ogt, %8, %9 : vector<8x128xf32>
    %cst_8 = arith.constant 1.000000e+01 : f32
    %11 = vector.broadcast %cst_8 : f32 to vector<8x128xf32>
    %12 = arith.cmpf olt, %8, %11 : vector<8x128xf32>
    %13 = arith.andi %10, %12 : vector<8x128xi1>
    %c1_i32 = arith.constant 1 : i32
    %14 = arith.muli %arg1, %c1_i32 : i32
    %15 = arith.addi %14, %arg2 : i32
    %c8_i32 = arith.constant 8 : i32
    %16 = arith.muli %15, %c8_i32 : i32
    %17 = tpu.iota {dimensions = array<i32: 0>} : vector<8x128xi32>
    %18 = vector.broadcast %16 : i32 to vector<8x128xi32>
    %19 = arith.addi %18, %17 : vector<8x128xi32>
    %c2_i32 = arith.constant 2 : i32
    %20 = vector.broadcast %c2_i32 : i32 to vector<8x128xi32>
    %21 = arith.cmpi slt, %19, %20 : vector<8x128xi32>
    %22 = arith.andi %13, %21 : vector<8x128xi1>
    %23 = arith.subf %6, %8 : vector<8x128xf32>
    %24 = math.absf %23 : vector<8x128xf32>
    %cst_9 = arith.constant 0.000000e+00 : f32
    %25 = vector.broadcast %cst_9 : f32 to vector<8x128xf32>
    %26 = arith.select %22, %24, %25 : vector<8x128xi1>, vector<8x128xf32>
    %c0_10 = arith.constant 0 : index
    %c0_11 = arith.constant 0 : index
    %c0_12 = arith.constant 0 : index
    %c0_13 = arith.constant 0 : index
    %27 = vector.load %arg6[%c0_10, %c0_11, %c0_12, %c0_13] : memref<1x1x8x128xf32, #tpu.memory_space<vmem>>, vector<1x1x8x128xf32>
    %28 = vector.shape_cast %27 : vector<1x1x8x128xf32> to vector<8x128xf32>
    %29 = vector.shape_cast %26 : vector<8x128xf32> to vector<1x8x128xf32>
    %cst_14 = arith.constant dense<0.000000e+00> : vector<8x128xf32>
    %30 = vector.multi_reduction <add>, %29, %cst_14 [0] : vector<1x8x128xf32> to vector<8x128xf32>
    %31 = arith.addf %28, %30 : vector<8x128xf32>
    %c0_15 = arith.constant 0 : index
    %c0_16 = arith.constant 0 : index
    %c0_17 = arith.constant 0 : index
    %c0_18 = arith.constant 0 : index
    %32 = vector.load %arg6[%c0_15, %c0_16, %c0_17, %c0_18] : memref<1x1x8x128xf32, #tpu.memory_space<vmem>>, vector<1x1x8x128xf32>
    %33 = vector.shape_cast %32 : vector<1x1x8x128xf32> to vector<8x128xf32>
    %34 = vector.shape_cast %31 : vector<8x128xf32> to vector<1x1x8x128xf32>
    tpu.vector_store %arg6[%c0_15, %c0_16, %c0_17, %c0_18], %34 {strides = array<i32>} : memref<1x1x8x128xf32, #tpu.memory_space<vmem>>, vector<1x1x8x128xf32>,
    return
  }
  func.func @transform_0(%arg0: i32, %arg1: i32, %arg2: i32, %arg3: i32) -> (i32, i32, i32) {
    %c1_i32 = arith.constant 1 : i32
    %0 = arith.muli %arg1, %c1_i32 : i32
    %1 = arith.addi %0, %arg2 : i32
    %c0_i32 = arith.constant 0 : i32
    %c0_i32_0 = arith.constant 0 : i32
    return %arg0, %1, %c0_i32 : i32, i32, i32
  }
  func.func @transform_1(%arg0: i32, %arg1: i32, %arg2: i32, %arg3: i32) -> (i32, i32, i32, i32) {
    %c1_i32 = arith.constant 1 : i32
    %0 = arith.muli %arg1, %c1_i32 : i32
    %1 = arith.addi %0, %arg2 : i32
    %c0_i32 = arith.constant 0 : i32
    %c0_i32_0 = arith.constant 0 : i32
    return %arg0, %arg3, %1, %c0_i32 : i32, i32, i32, i32
  }
  func.func @transform_2(%arg0: i32, %arg1: i32, %arg2: i32, %arg3: i32) -> (i32, i32, i32, i32) {
    %c0_i32 = arith.constant 0 : i32
    %c0_i32_0 = arith.constant 0 : i32
    %c0_i32_1 = arith.constant 0 : i32
    return %arg0, %arg1, %c0_i32, %c0_i32_0 : i32, i32, i32, i32
  }
}

</mosaic_0001>

<bundles_post_ra>
// kernel: tpu_custom_call.1
= control target key start
LH: loop header
LB: loop body
LE: loop exit
PB: predicated region body
PF: predicated region fallthrough
CT: control target
= control target key end

     0   :  { %7 = vsyncpa [#allocation3], 0  ;;  %s792_s0 = inlined_call_operand.hbm [shape: f32[2,2,128], index: 0, kind: input, shape index: {}]   ;;  %s793_s1 = inlined_call_operand.hbm [shape: f32[2,1,2,128], index: 1, kind: input, shape index: {}]   ;;  %s794_s2 = inlined_call_operand.hbm [shape: f32[2,1,8,128], index: 2, kind: output, shape index: {}]  }
   0x1   :  { %9 = vsyncpa [#allocation3 + $0x1], 0 }
   0x2   :  { %10 = vsyncpa [#allocation6], 0 }
   0x3   :  { %12 = vsyncpa [#allocation6 + $0x1], 0 }
   0x4   :  { %13 = vsyncpa [#allocation4], 0 }
   0x5   :  { %15 = vsyncpa [#allocation4 + $0x1], 0  ;;  %s659_s9 = smov 0   ;;  %s661_s10 = smov 0  }
   0x6   :  { %s663_s11 = smov 0   ;;  %s665_s12 = smov 0  }
   0x7   :  { %s667_s13 = smov 0   ;;  %s669_s14 = smov 0  }
   0x8 LB: > { %s426_s15 = sadd.s32 4294967295, %s638_s14   ;;  %s427_s16 = sadd.s32 4294967294, %s638_s14   ;;  %s638_s14 = sphi %s669_s14, %s21_s14   ;;  %s634_s13 = sphi %s667_s13, %s803_s13   ;;  %s630_s12 = sphi %s665_s12, %s802_s12   ;;  %s626_s11 = sphi %s663_s11, %s801_s11   ;;  %s622_s10 = sphi %s661_s10, %s800_s10   ;;  %s618_s9 = sphi %s659_s9, %s799_s9  }
   0x9   : > { %s47_s17 = sadd.s32 1, %s634_s13  ;;  %s58_s18 = sadd.s32 1, %s626_s11 }
   0xa   : > { %p49_p0 = scmp.ge.s32.totalorder %s47_s17, 2  ;;  %p65_p1 = scmp.ne.s32.totalorder %s626_s11, %s622_s10 }
   0xb   : > { %p66_p2 = scmp.eq.s32.totalorder %s638_s14, 0  ;;  %p71_p3 = scmp.ne.s32.totalorder %s622_s10, %s618_s9 }
   0xc   : > { %s805_s17 = smov (%p49_p0, %s47_s17), 0  ;;  %p72_p5 = scmp.eq.s32.totalorder %s426_s15, 0 }
   0xd   : > { %p700_p4 = por %p66_p2, %p65_p1  ;;  %s53_s20 = ssub.s32 %s634_s13, %s805_s17 }
   0xe   : > { %p129_p6 = scmp.eq.s32.totalorder %s426_s15, 1  ;;  %p56_p7 = scmp.eq.s32.totalorder %s53_s20, 0 }
   0xf   : > { %p706_p8 = por %p72_p5, %p71_p3  ;;  %p135_p10 = scmp.eq.s32.totalorder %s427_s16, 1 }
  0x10   : > { %p710_p9 = por %p129_p6, %p65_p1  ;;  %p429_p12 = scmp.ge.s32.totalorder %s638_s14, 2 }
  0x11   : > { %s715_s23 = scalar_select %p56_p7, %s626_s11, %s58_s18  }
  0x12   : > { %p717_p11 = por %p135_p10, %p71_p3  ;;  %151 = sbr.rel (%p429_p12) target bundleno = 41 (0x29), region = 16 }
  0x17   : > { %154 = sbr.rel (!%p700_p4) target bundleno = 32 (0x20), region = 20  ;;  %s155_s25 = sand.u32 (%p700_p4), 1, %s626_s11  }
  0x18   : > { %s430_s26 = sshll.u32 (%p700_p4), %s155_s25, 3  ;;  %s156_s27 = scalar_lea.sflag (%p700_p4), [#allocation3], %s155_s25 }
  0x19   : > { %s159_s28 = scalar_lea.vmem (%p700_p4), [#allocation2], %s430_s26 }
  0x1c   : > { %166 = vsyncadd %s156_s27, 96  ;;  %s431_s29 = sshll.u32 %s634_s13, 1  ;;  %s174_s30 = sshll.u32 %s159_s28, 4  ;;  %s175_s30 = int_to_ptr.vmem [resolvable:$true] %s174_s30 }
  0x1d   : > { %s170_s5 = scalar_lea.hbm %s792_s0, %s431_s29  ;;  %s640_s7 = smov 32  }
  0x1e   : > { %s172_s6 = sshll.u32 %s170_s5, 4  ;;  %s641_s8 = smov 2   ;;  %s173_s6 = int_to_ptr.hbm [resolvable:$true] %s172_s6 }
  0x1f   : > { %180 = dma.hbm_to_vmem [thread:$0]  %s173_s6, 32, %s175_s30, %s156_s27, %s640_s7, %s640_s7, %s641_s8  }
  0x20 PF: > { %183 = sbr.rel (!%p700_p4) target bundleno = 41 (0x29), region = 24  ;;  %s184_s15 = sand.u32 (%p700_p4), 1, %s626_s11  }
  0x21   : > { %s432_s16 = sshll.u32 (%p700_p4), %s184_s15, 3  ;;  %s185_s18 = scalar_lea.sflag (%p700_p4), [#allocation6], %s184_s15 }
  0x22   : > { %s188_s20 = scalar_lea.vmem (%p700_p4), [#allocation5], %s432_s16 }
  0x25   : > { %195 = vsyncadd %s185_s18, 96  ;;  %s433_s25 = sshll.u32 %s634_s13, 1  ;;  %s204_s26 = sshll.u32 %s188_s20, 4  ;;  %s205_s26 = int_to_ptr.vmem [resolvable:$true] %s204_s26 }
  0x26   : > { %s200_s3 = scalar_lea.hbm %s793_s1, %s433_s25  ;;  %s642_s27 = smov 32  }
  0x27   : > { %s202_s4 = sshll.u32 %s200_s3, 4  ;;  %s643_s30 = smov 2   ;;  %s203_s4 = int_to_ptr.hbm [resolvable:$true] %s202_s4 }
  0x28   : > { %210 = dma.hbm_to_vmem [thread:$0]  %s203_s4, 32, %s205_s26, %s185_s18, %s642_s27, %s642_s27, %s643_s30  }
  0x29 PF: > { %p434_p13 = scmp.ge.s32.totalorder %s638_s14, 1  ;;  %p212_p0 = scmp.lt.s32.totalorder %s638_s14, 3 }
  0x2b   : > { %p213_p1 = pnand %p434_p13, %p212_p0 }
  0x2c   : > { %s741_s19 = sand.u32 (!%p213_p1), 1, %s622_s10  }
  0x2d   : > { %216 = sbr.rel (%p213_p1) target bundleno = 68 (0x44), region = 28  ;;  %s435_s5 = sshll.u32 (!%p213_p1), %s741_s19, 3 }
  0x2e   : > { %s219_s6 = scalar_lea.sflag (!%p213_p1), [#allocation3], %s741_s19  ;;  %s222_s7 = scalar_lea.vmem (!%p213_p1), [#allocation2], %s435_s5 }
  0x32   : > { %605 = dma.done.wait (%p706_p8), %s219_s6, 128  }
  0x33   : > { %607 = vsyncadd (%p706_p8), %s219_s6, 4294967168  ;;  %s229_s8 = scalar_lea.sflag [#allocation6], %s741_s19  ;;  %s232_s15 = scalar_lea.vmem [#allocation5], %s435_s5 }
  0x34   : > { %609 = dma.done.wait (%p706_p8), %s229_s8, 128  }
  0x35   : > { %611 = vsyncadd (%p706_p8), %s229_s8, 4294967168  ;;  %v281_v0 = vlaneseq  ;;  %s439_s16 = sshll.u32 %s630_s12, 3  ;;  %v274_v2 = vld [vmem:[%s222_s7] sm:$0xff]  ;;  %v275_v3 = vld [vmem:[%s232_s15] sm:$0xff]  ;;  %s258_s21 = scalar_lea.vmem [#allocation7], %s435_s5 }
  0x36   : > { %s306_s25 = scalar_lea.hbm %s794_s2, %s439_s16  ;;  %vm276_vm1 = vcmp.gt.f32.partialorder %v275_v3, 0.001  ;;  %vm277_vm2 = vcmp.lt.f32.partialorder %v275_v3, 10.0  ;;  %v287_v4 = vsub.f32 %v274_v2, %v275_v3  ;;  %s308_s26 = sshll.u32 %s258_s21, 4  ;;  %s309_s26 = int_to_ptr.vmem [resolvable:$true] %s308_s26 }
  0x37   : > { %v282_v1 = vshrl.u32 %v281_v0, 7  ;;  %vm278_vm3 = vmand %vm276_vm1, %vm277_vm2  ;;  %s310_s28 = sshll.u32 %s306_s25, 4  ;;  %s295_s12 = scalar_lea.sflag [#allocation4], %s741_s19  ;;  %s311_s28 = int_to_ptr.hbm [resolvable:$true] %s310_s28 }
  0x38   : > { %v288_v5 = vand.u32 2147483647, %v287_v4  ;;  %s566_s29 = sshra.s32 %s311_s28, 4  ;;  %s572_s30 = scalar_lea.hbm %s794_s2, 16  ;;  %s567_s29 = int_to_ptr.hbm [resolvable:$true] %s566_s29 }
  0x39   : > { %vm285_vm0 = vcmp.lt.s32.totalorder %v282_v1, 2  ;;  %s568_s3 = scalar_lea.hbm %s567_s29, 8  ;;  %p573_p5 = scmp.lt.s32.totalorder %s567_s29, %s794_s2 }
  0x3a   : > { %vm286_vm4 = vmand %vm278_vm3, %vm285_vm0  ;;  %p569_p2 = scmp.ne.s32.totalorder %s567_s29, %s568_s3  ;;  %p574_p6 = scmp.lt.s32.totalorder %s572_s30, %s568_s3 }
  0x3b   : > { %v289_v6 = vsel %vm286_vm4, %v288_v5, 0.0 }
  0x3c   : > { %293 = vst [vmem:[%s258_s21] sm:$0xff] %v289_v6  ;;  %p570_p3 = pnand %p569_p2, %p710_p9  ;;  %p575_p7 = por %p574_p6, %p573_p5 }
  0x3e   : > { %p571_p4 = pneg %p570_p3 }
  0x40   : > { %p576_p8 = pnand %p575_p7, %p571_p4 }
  0x42   : > { %579 = shalt.err (!%p576_p8)
}
  0x43   : > { %444 = dma.vmem_to_hbm [thread:$0]  (%p710_p9), %s309_s26, 128, %s311_s28, %s295_s12  }
  0x44 PF: > { %s322_s19 = sand.u32 1, %s618_s9   ;;  %p447_p10 = pnand %p429_p12, %p717_p11 }
  0x45   : > { %s323_s7 = scalar_lea.sflag [#allocation4], %s322_s19 }
  0x46   : > { %p448_p13 = pneg %p447_p10 }
  0x48   : > { %613 = dma.done.wait (%p448_p13), %s323_s7, 128  }
  0x49   : > { %615 = vsyncadd (%p448_p13), %s323_s7, 4294967168  ;;  %s21_s14 = sadd.s32 1, %s638_s14   ;;  %s799_s9 = smov %s622_s10 }
  0x4a   : > { %p18_p0 = scmp.ge.s32.totalorder %s21_s14, 4   ;;  %s800_s10 = smov %s626_s11 }
  0x4b   : > { %s801_s11 = smov %s715_s23  ;;  %s802_s12 = smov %s634_s13 }
  0x4c   : > { %s803_s13 = smov %s805_s17  ;;  %20 = sbr.rel (!%p18_p0) target bundleno = 8 (0x8), region = 90 }
  0x51   :  { %329 = vsyncpa [#allocation3], 1 }
  0x52   :  { %331 = vsyncpa [#allocation3 + $0x1], 1 }
  0x53   :  { %332 = vsyncpa [#allocation6], 1 }
  0x54   :  { %334 = vsyncpa [#allocation6 + $0x1], 1 }
  0x55   :  { %335 = vsyncpa [#allocation4], 1 }
  0x56   :  { %337 = vsyncpa [#allocation4 + $0x1], 1 }

</bundles_post_ra>
